<compile_context>
chip_gen: v7x
topology: tpu7x:2x2x1
jax: 0.10.0
libtpu: 0.0.40
codegen_flags: <defaults>
</compile_context>

<pallas_src>
import math

import numpy as np
import jax
import jax.numpy as jnp
from jax.experimental import pallas as pl
from jax.experimental.pallas import tpu as pltpu


# ---------------------------------------------------------------------------
# Positional encodings (host-side constants — FixEncoding caches them anyway).
# ---------------------------------------------------------------------------
def _interleave_sincos(sin_inp):
    # == positional_encodings.get_emb: interleave sin/cos on the last axis.
    return np.stack([np.sin(sin_inp), np.cos(sin_inp)], axis=-1).reshape(
        *sin_inp.shape[:-1], -1)


def positional_encoding_2d(h, w, org_channels):
    channels = int(np.ceil(org_channels / 4) * 2)
    inv_freq = 1.0 / (10000.0 ** (np.arange(0, channels, 2) / float(channels)))
    pos_x = np.arange(h, dtype=np.float64)
    pos_y = np.arange(w, dtype=np.float64)
    emb_x = _interleave_sincos(pos_x[:, None] * inv_freq[None, :])  # (h, channels)
    emb_y = _interleave_sincos(pos_y[:, None] * inv_freq[None, :])  # (w, channels)
    emb = np.zeros((h, w, channels * 2), dtype=np.float64)
    emb[:, :, :channels] = emb_x[:, None, :]
    emb[:, :, channels:] = emb_y[None, :, :]
    return emb[:, :, :org_channels].astype(np.float32)


def diagonal_positional_encoding_2d(h, w, org_channels):
    # TODO(synk): upstream DiagonalPositionalEncoding2D source not provided;
    # implemented as sinusoidal encoding of the two diagonal indices (i+j, i-j).
    channels = int(np.ceil(org_channels / 4) * 2)
    inv_freq = 1.0 / (10000.0 ** (np.arange(0, channels, 2) / float(channels)))
    ii, jj = np.meshgrid(np.arange(h, dtype=np.float64),
                         np.arange(w, dtype=np.float64), indexing="ij")
    d1 = ii + jj                 # anti-diagonal index
    d2 = ii - jj + (w - 1)       # main-diagonal index (shifted non-negative)
    emb = np.zeros((h, w, channels * 2), dtype=np.float64)
    emb[:, :, :channels] = _interleave_sincos(d1[..., None] * inv_freq)
    emb[:, :, channels:] = _interleave_sincos(d2[..., None] * inv_freq)
    return emb[:, :, :org_channels].astype(np.float32)


P_FIELDS = 6   # pieces, players, current_player, walkable, hills, hill_unholds


# ---------------------------------------------------------------------------
# Pallas kernel.  Per tile:
#   1) MXU routing matmul: broadcast/scatter each square's 6 packed fields into
#      its K-lane segment (R squares packed per 256-lane row).
#   2) one compare + one select build the fused one-hot / raw-value features.
#   3) one MXU matmul against the block-diagonal pre-fused weight.
#   4) add the folded positional(+diagonal+bias) constant (periodic in rows).
# Output rows are lane-dense (R*E lanes) -> unmasked stores.
# ---------------------------------------------------------------------------
def _emb_kernel(packed_ref, route_ref, w4_ref, consts_ref, pos_ref, out_ref):
    f32 = jnp.float32

    # (tnr, R*P) @ (R*P, R*K) -> (tnr, R*K): each lane holds its own field's
    # value (pieces / pre-biased players / pre-biased current_player / extras).
    fval = jnp.dot(packed_ref[...], route_ref[...], preferred_element_type=f32)

    consts = consts_ref[...]                 # (2, R*K) f32
    local = consts[0:1, :]                   # in-segment lane index; -1 at value lanes
    emask = consts[1:2, :]                   # 1.0 at walkable/hills/hill_unholds lanes
    onehot = (fval == local).astype(f32)
    feat = jnp.where(emask != 0.0, fval, onehot)            # (tnr, R*K)

    # Single fused MXU push against the block-diagonal (R*K, R*E) weight.
    y = jnp.dot(feat, w4_ref[...], preferred_element_type=f32)  # (tnr, R*E)

    # Folded positional constant: periodic with period pos_rows packed rows;
    # the reshape is tile-aligned (pos_rows % 8 == 0, lanes % 128 == 0) -> free.
    tnr, lanes = y.shape
    pr = pos_ref.shape[0]
    y = y.reshape(tnr // pr, pr, lanes) + pos_ref[...][None, :, :]
    out_ref[...] = y.reshape(tnr, lanes)


# ---------------------------------------------------------------------------
# One-time parameter preparation (hoisted out of the forward pass).
# ---------------------------------------------------------------------------
def prepare_params(params, pos_enc, dia_enc, *, piece_dim, embed_dim, H, W,
                   target_lanes=256):
    E = int(embed_dim)
    HW = H * W
    pd = int(piece_dim)
    hi = jax.lax.Precision.HIGHEST

    # R consecutive board squares share one lane-dense MXU push.
    # 256 output lanes fills the 256-wide v6e/v7x MXU; 128 / 1 are fallbacks.
    R = 1
    for lanes in (int(target_lanes), 128):
        if lanes >= E and lanes % E == 0:
            R = lanes // E
            break
    # Fused one-hot/feature columns per square, padded so R*K is lane-dense.
    q = 128 // math.gcd(R, 128)
    K = -(-(pd + 9) // q) * q
    RP, RK, RE = R * P_FIELDS, R * K, R * E

    # bf16 is exact for the small integer / boolean fields; halves input DMA.
    packed_dtype = jnp.bfloat16 if (pd + 9) <= 256 else jnp.float32

    w_t = params["linear_w"].T.astype(jnp.float32)            # (3E+9, E)
    w_tok, w_pos, w_dia = w_t[0:E], w_t[E:2 * E], w_t[2 * E:3 * E]
    w_pl = w_t[3 * E:3 * E + 3]
    w_cur = w_t[3 * E + 3:3 * E + 6]
    w_ext = w_t[3 * E + 6:3 * E + 9]

    # nn.Embedding followed by its Linear segment == pre-fused (piece_dim, E).
    w_piece = jnp.dot(params["emb_table"].astype(jnp.float32), w_tok, precision=hi)
    w_fused = jnp.concatenate([w_piece, w_pl, w_cur, w_ext], axis=0)   # (pd+9, E)
    w_fused = jnp.pad(w_fused, ((0, K - (pd + 9)), (0, 0)))            # (K, E)

    # Block-diagonal fused weight (kept f32 — don't downcast, precision budget).
    w4 = jnp.zeros((RK, RE), jnp.float32)
    for j in range(R):
        w4 = w4.at[j * K:(j + 1) * K, j * E:(j + 1) * E].set(w_fused)

    # Routing matrix: scatters/broadcasts each square's 6 packed fields into
    # its K-segment.  0/1 entries -> exact in bf16.
    route = np.zeros((RP, RK), np.float32)
    local = np.tile(np.arange(K, dtype=np.float32), R)
    emask = np.zeros((RK,), np.float32)
    for j in range(R):
        o = j * K
        route[j * P_FIELDS + 0, o:o + pd] = 1.0                  # pieces
        route[j * P_FIELDS + 1, o + pd:o + pd + 3] = 1.0         # players (+pd)
        route[j * P_FIELDS + 2, o + pd + 3:o + pd + 6] = 1.0     # current (+pd+3)
        for e in range(3):                                       # raw-value lanes
            route[j * P_FIELDS + 3 + e, o + pd + 6 + e] = 1.0
        emask[o + pd + 6:o + pd + 9] = 1.0
        local[o + pd + 6:o + pd + 9] = -1.0   # value lanes never one-hot match
    route = jnp.asarray(route, packed_dtype)
    consts = jnp.asarray(np.stack([local, emask], axis=0))       # (2, RK) f32

    # Positional + diagonal terms + bias folded into one additive constant,
    # pre-tiled to one "base unit" of flat rows (the tile-size quantum).
    pos_flat = jnp.asarray(pos_enc, jnp.float32).reshape(HW, E)
    dia_flat = jnp.asarray(dia_enc, jnp.float32).reshape(HW, E)
    pos_plus = (jnp.dot(pos_flat, w_pos, precision=hi)
                + jnp.dot(dia_flat, w_dia, precision=hi)
                + params["linear_b"].astype(jnp.float32)[None, :])     # (HW, E)
    base = (HW * 16 * R) // math.gcd(HW, 16 * R)     # lcm(HW, 16R) flat rows
    pos_base = jnp.tile(pos_plus, (base // HW, 1)).reshape(base // R, RE)

    return dict(route=route, w4=w4, consts=consts, pos_base=pos_base,
                piece_dim=pd, E=E, R=R, K=K, HW=HW, base=base,
                packed_dtype=packed_dtype)


def _pick_tile_units(N, base, bytes_per_unit, target_bytes=2 << 20):
    """How many 'base' row-units per grid step (target ~2 MB output / step)."""
    total = -(-N // base)
    cap = max(1, int(target_bytes) // int(bytes_per_unit))
    if total <= cap:
        return total                         # single step, no padding
    # Largest divisor of `total` within the cap -> tn divides N, no padding.
    best = 1
    for u in range(cap, 0, -1):
        if total % u == 0:
            best = u
            break
    # Mild preference for an even step count (v7x megacore has 2 TCs).
    if (total // best) % 2 == 1:
        for u in range(best - 1, max(best // 2, 0), -1):
            if total % u == 0 and (total // u) % 2 == 0:
                best = u
                break
    # If divisibility forces tiny (overhead-bound) tiles, pad instead.
    if best * 8 < cap:
        best = cap
    return best


# ---------------------------------------------------------------------------
# Forward wrapper
# ---------------------------------------------------------------------------
def token_position_piece_player_embedding(pieces, players, current_player,
                                          walkable, hills, hill_unholds, prep):
    B, H, W = pieces.shape
    E, R = prep["E"], prep["R"]
    HW, pd, base = prep["HW"], prep["piece_dim"], prep["base"]
    pdt = prep["packed_dtype"]
    assert HW == H * W, "prepared params were built for a different board shape"
    N = B * HW

    # Single packed feature stream; players / current_player pre-biased so the
    # in-kernel one-hot compare target is simply the in-segment lane index.
    packed = jnp.stack(
        [pieces.astype(pdt),
         (players + pd).astype(pdt),
         (current_player + pd + 3).astype(pdt),
         walkable.astype(pdt), hills.astype(pdt), hill_unholds.astype(pdt)],
        axis=-1).reshape(N, P_FIELDS)

    units = _pick_tile_units(N, base, bytes_per_unit=base * E * 4)
    tn = base * units                         # flat rows per grid step
    n_padded = -(-N // tn) * tn
    if n_padded != N:
        packed = jnp.pad(packed, ((0, n_padded - N), (0, 0)))

    tnr = tn // R
    nr = n_padded // R
    packed4 = packed.reshape(nr, R * P_FIELDS)   # row-major view, no data move

    out4 = pl.pallas_call(
        _emb_kernel,
        out_shape=jax.ShapeDtypeStruct((nr, R * E), jnp.float32),
        grid=(n_padded // tn,),
        in_specs=[
            pl.BlockSpec((tnr, R * P_FIELDS), lambda i: (i, 0)),
            pl.BlockSpec(prep["route"].shape, lambda i: (0, 0)),    # VMEM-resident
            pl.BlockSpec(prep["w4"].shape, lambda i: (0, 0)),       # VMEM-resident
            pl.BlockSpec(prep["consts"].shape, lambda i: (0, 0)),   # VMEM-resident
            pl.BlockSpec(prep["pos_base"].shape, lambda i: (0, 0)),  # VMEM-resident
        ],
        out_specs=pl.BlockSpec((tnr, R * E), lambda i: (i, 0)),
        compiler_params=pltpu.CompilerParams(
            dimension_semantics=("parallel",)),
    )(packed4, prep["route"], prep["w4"], prep["consts"], prep["pos_base"])

    if n_padded == N:
        return out4.reshape(B, H, W, E)       # metadata-only reshape
    return out4.reshape(n_padded, E)[:N].reshape(B, H, W, E)


# ---------------------------------------------------------------------------
# Pure-JAX reference (mirrors the torch forward exactly)
# ---------------------------------------------------------------------------
def reference(pieces, players, current_player, walkable, hills, hill_unholds,
              params, pos_enc, dia_enc):
    B, H, W = pieces.shape
    E = params["emb_table"].shape[1]
    token_emb = params["emb_table"][pieces]
    players_emb = jax.nn.one_hot(players, 3)
    cur_emb = jax.nn.one_hot(current_player, 3)
    pos_b = jnp.broadcast_to(pos_enc[None], (B, H, W, E))
    dia_b = jnp.broadcast_to(dia_enc[None], (B, H, W, E))
    x = jnp.concatenate(
        [token_emb, pos_b, dia_b, players_emb, cur_emb,
         walkable[..., None], hills[..., None], hill_unholds[..., None]],
        axis=-1)
    return (jnp.dot(x, params["linear_w"].T, precision=jax.lax.Precision.HIGHEST)
            + params["linear_b"])


if __name__ == "__main__":
    key = jax.random.PRNGKey(0)
    B, H, W = 2, 8, 8
    piece_dim, player_dim, embed_dim = 13, 3, 32
    f_in = 3 * embed_dim + 2 * player_dim + 3  # input_dims + 3

    ks = jax.random.split(key, 10)
    params = {
        "emb_table": jax.random.normal(ks[0], (piece_dim, embed_dim), jnp.float32),
        "linear_w": (jax.random.uniform(ks[1], (embed_dim, f_in), jnp.float32)
                     - 0.5) * (2.0 / np.sqrt(f_in)),
        "linear_b": (jax.random.uniform(ks[2], (embed_dim,), jnp.float32)
                     - 0.5) * (2.0 / np.sqrt(f_in)),
    }

    pieces = jax.random.randint(ks[3], (B, H, W), 0, piece_dim, jnp.int32)
    players = jax.random.randint(ks[4], (B, H, W), 0, 3, jnp.int32)
    current_player = jnp.broadcast_to(
        jax.random.randint(ks[5], (B, 1, 1), 0, 3, jnp.int32), (B, H, W))
    walkable = jax.random.bernoulli(ks[6], 0.8, (B, H, W)).astype(jnp.float32)
    hills = jax.random.bernoulli(ks[7], 0.2, (B, H, W)).astype(jnp.float32)
    hill_unholds = jax.random.bernoulli(ks[8], 0.1, (B, H, W)).astype(jnp.float32)

    pos_enc = jnp.asarray(positional_encoding_2d(H, W, embed_dim))
    dia_enc = jnp.asarray(diagonal_positional_encoding_2d(H, W, embed_dim))

    # One-time parameter prep (hoisted out of the per-step forward).
    prep = prepare_params(params, pos_enc, dia_enc, piece_dim=piece_dim,
                          embed_dim=embed_dim, H=H, W=W)

    out = token_position_piece_player_embedding(
        pieces, players, current_player, walkable, hills, hill_unholds, prep)
    out = jax.block_until_ready(out)

    ref = reference(pieces, players, current_player, walkable, hills,
                    hill_unholds, params, pos_enc, dia_enc)
    assert out.shape == (B, H, W, embed_dim)
    np.testing.assert_allclose(np.asarray(out), np.asarray(ref),
                               rtol=1e-4, atol=1e-4)
    print("KERNEL_OK")
</pallas_src>

<mosaic_0001>
module attributes {stable_mosaic.version = 11 : i64} {
  func.func @_emb_kernel(%arg0: i32, %arg1: memref<16x48xbf16, #tpu.memory_space<vmem>>, %arg2: memref<48x256xbf16, #tpu.memory_space<vmem>>, %arg3: memref<256x256xf32, #tpu.memory_space<vmem>>, %arg4: memref<2x256xf32, #tpu.memory_space<vmem>>, %arg5: memref<16x256xf32, #tpu.memory_space<vmem>>, %arg6: memref<16x256xf32, #tpu.memory_space<vmem>>) attributes {dimension_semantics = [#tpu.dimension_semantics<parallel>], iteration_bounds = array<i64: 1>, scalar_prefetch = 0 : i64, scratch_operands = 0 : i64, tpu.core_type = #tpu.core_type<tc>, window_params = [{transform_indices = @transform_0, window_bounds = array<i64: 16, 48>}, {pipeline_mode = #tpu.pipeline_mode<synchronous>, transform_indices = @transform_1, window_bounds = array<i64: 48, 256>}, {pipeline_mode = #tpu.pipeline_mode<synchronous>, transform_indices = @transform_2, window_bounds = array<i64: 256, 256>}, {pipeline_mode = #tpu.pipeline_mode<synchronous>, transform_indices = @transform_3, window_bounds = array<i64: 2, 256>}, {pipeline_mode = #tpu.pipeline_mode<synchronous>, transform_indices = @transform_4, window_bounds = array<i64: 16, 256>}, {transform_indices = @transform_5, window_bounds = array<i64: 16, 256>}]} {
    %c0 = arith.constant 0 : index
    %c0_0 = arith.constant 0 : index
    %0 = vector.load %arg1[%c0, %c0_0] : memref<16x48xbf16, #tpu.memory_space<vmem>>, vector<16x48xbf16>
    %c0_1 = arith.constant 0 : index
    %c0_2 = arith.constant 0 : index
    %1 = vector.load %arg2[%c0_1, %c0_2] : memref<48x256xbf16, #tpu.memory_space<vmem>>, vector<48x256xbf16>
    %cst = arith.constant dense<0.000000e+00> : vector<16x256xf32>
    %2 = tpu.matmul %0, %1, %cst {dimension_numbers = #tpu.dot_dimension_numbers<[1], [0], [0], [1], [0, 0, 1, 1], [], []>} : vector<16x48xbf16>, vector<48x256xbf16>, vector<16x256xf32> -> vector<16x256xf32>
    %c0_3 = arith.constant 0 : index
    %c0_4 = arith.constant 0 : index
    %3 = vector.load %arg4[%c0_3, %c0_4] : memref<2x256xf32, #tpu.memory_space<vmem>>, vector<2x256xf32>
    %4 = vector.extract_strided_slice %3 {offsets = [0, 0], sizes = [1, 256], strides = [1, 1]} : vector<2x256xf32> to vector<1x256xf32>
    %5 = vector.extract_strided_slice %3 {offsets = [1, 0], sizes = [1, 256], strides = [1, 1]} : vector<2x256xf32> to vector<1x256xf32>
    %6 = vector.broadcast %4 : vector<1x256xf32> to vector<16x256xf32>
    %7 = arith.cmpf oeq, %2, %6 : vector<16x256xf32>
    %8 = arith.extui %7 : vector<16x256xi1> to vector<16x256xi32>
    %9 = arith.sitofp %8 : vector<16x256xi32> to vector<16x256xf32>
    %cst_5 = arith.constant 0.000000e+00 : f32
    %10 = vector.broadcast %cst_5 : f32 to vector<1x256xf32>
    %11 = arith.cmpf one, %5, %10 : vector<1x256xf32>
    %12 = vector.shape_cast %11 : vector<1x256xi1> to vector<1x256xi1>
    %13 = vector.broadcast %12 : vector<1x256xi1> to vector<16x256xi1>
    %14 = arith.select %13, %2, %9 : vector<16x256xi1>, vector<16x256xf32>
    %c0_6 = arith.constant 0 : index
    %c0_7 = arith.constant 0 : index
    %15 = vector.load %arg3[%c0_6, %c0_7] : memref<256x256xf32, #tpu.memory_space<vmem>>, vector<256x256xf32>
    %cst_8 = arith.constant dense<0.000000e+00> : vector<16x256xf32>
    %16 = tpu.matmul %14, %15, %cst_8 {dimension_numbers = #tpu.dot_dimension_numbers<[1], [0], [0], [1], [0, 0, 1, 1], [], []>} : vector<16x256xf32>, vector<256x256xf32>, vector<16x256xf32> -> vector<16x256xf32>
    %17 = vector.shape_cast %16 : vector<16x256xf32> to vector<1x16x256xf32>
    %c0_9 = arith.constant 0 : index
    %c0_10 = arith.constant 0 : index
    %18 = vector.load %arg5[%c0_9, %c0_10] : memref<16x256xf32, #tpu.memory_space<vmem>>, vector<16x256xf32>
    %19 = vector.shape_cast %18 : vector<16x256xf32> to vector<1x16x256xf32>
    %20 = arith.addf %17, %19 : vector<1x16x256xf32>
    %21 = vector.shape_cast %20 : vector<1x16x256xf32> to vector<16x256xf32>
    %c0_11 = arith.constant 0 : index
    %c0_12 = arith.constant 0 : index
    %22 = vector.load %arg6[%c0_11, %c0_12] : memref<16x256xf32, #tpu.memory_space<vmem>>, vector<16x256xf32>
    tpu.vector_store %arg6[%c0_11, %c0_12], %21 {strides = array<i32>} : memref<16x256xf32, #tpu.memory_space<vmem>>, vector<16x256xf32>,
    return
  }
  func.func @transform_0(%arg0: i32) -> (i32, i32) {
    %c0_i32 = arith.constant 0 : i32
    %c0_i32_0 = arith.constant 0 : i32
    return %arg0, %c0_i32 : i32, i32
  }
  func.func @transform_1(%arg0: i32) -> (i32, i32) {
    %c0_i32 = arith.constant 0 : i32
    %c0_i32_0 = arith.constant 0 : i32
    %c0_i32_1 = arith.constant 0 : i32
    return %c0_i32, %c0_i32_0 : i32, i32
  }
  func.func @transform_2(%arg0: i32) -> (i32, i32) {
    %c0_i32 = arith.constant 0 : i32
    %c0_i32_0 = arith.constant 0 : i32
    %c0_i32_1 = arith.constant 0 : i32
    return %c0_i32, %c0_i32_0 : i32, i32
  }
  func.func @transform_3(%arg0: i32) -> (i32, i32) {
    %c0_i32 = arith.constant 0 : i32
    %c0_i32_0 = arith.constant 0 : i32
    %c0_i32_1 = arith.constant 0 : i32
    return %c0_i32, %c0_i32_0 : i32, i32
  }
  func.func @transform_4(%arg0: i32) -> (i32, i32) {
    %c0_i32 = arith.constant 0 : i32
    %c0_i32_0 = arith.constant 0 : i32
    %c0_i32_1 = arith.constant 0 : i32
    return %c0_i32, %c0_i32_0 : i32, i32
  }
  func.func @transform_5(%arg0: i32) -> (i32, i32) {
    %c0_i32 = arith.constant 0 : i32
    %c0_i32_0 = arith.constant 0 : i32
    return %arg0, %c0_i32 : i32, i32
  }
}

</mosaic_0001>

<bundles_post_ra>
// kernel: tpu_custom_call.1
= control target key start
LH: loop header
LB: loop body
LE: loop exit
PB: predicated region body
PF: predicated region fallthrough
CT: control target
= control target key end

     0   :  { %10 = vsyncpa [#allocation3], 0  ;;  %s739_s0 = inlined_call_operand.hbm [shape: bf16[16,48], index: 0, kind: input, shape index: {}]   ;;  %s740_s1 = inlined_call_operand.hbm [shape: bf16[48,256], index: 1, kind: input, shape index: {}]   ;;  %s741_s2 = inlined_call_operand.hbm [shape: f32[256,256], index: 2, kind: input, shape index: {}]   ;;  %s742_s3 = inlined_call_operand.vmem [shape: f32[2,256], index: 3, kind: input, shape index: {}]   ;;  %s743_s4 = inlined_call_operand.hbm [shape: f32[16,256], index: 4, kind: input, shape index: {}]   ;;  %s744_s5 = inlined_call_operand.hbm [shape: f32[16,256], index: 5, kind: output, shape index: {}]  }
   0x1   :  { %11 = vsyncpa [#allocation6], 0 }
   0x2   :  { %12 = vsyncpa [#allocation9], 0 }
   0x3   :  { %13 = vsyncpa [#allocation4], 0  ;;  %s612_s18 = smov [#allocation5]   ;;  %s494_s22 = scalar_lea.hbm %s740_s1, 768 }
   0x4   :  { %s31_s19 = sshll.u32 %s612_s18, 4  ;;  %p495_p0 = scmp.ne.s32.totalorder %s740_s1, %s494_s22  ;;  %s32_s19 = int_to_ptr.vmem [resolvable:$true] %s31_s19 }
   0x5   :  { %p498_p1 = scmp.lt.u32.totalorder %s494_s22, %s740_s1 }
   0x7   :  { %p500_p2 = pnand %p498_p1, %p495_p0 }
   0x9   :  { %503 = shalt.err (!%p500_p2)
}
   0xa   :  { %s504_s27 = scalar_lea.vmem %s32_s19, 768  ;;  %p509_p4 = scmp.lt.s32.totalorder %s32_s19, %s32_s19 }
   0xb   :  { %p505_p3 = scmp.ne.s32.totalorder %s32_s19, %s504_s27  ;;  %p510_p5 = scmp.lt.s32.totalorder %s504_s27, %s504_s27 }
   0xd   :  { %p511_p6 = por %p510_p5, %p509_p4 }
   0xf   :  { %p512_p7 = pnand %p511_p6, %p505_p3 }
  0x11   :  { %515 = shalt.err (!%p512_p7)
}
  0x12   :  { %s613_s28 = smov 128   ;;  %s614_s29 = smov 8  }
  0x13   :  { %37 = dma.hbm_to_vmem [thread:$0]  %s740_s1, 768, %s32_s19, [#allocation6], %s613_s28, %s613_s28, %s614_s29  }
  0x14   :  { %s615_s7 = smov [#allocation2]   ;;  %s516_s11 = scalar_lea.hbm %s739_s0, 128 }
  0x15   :  { %s19_s8 = sshll.u32 %s615_s7, 4  ;;  %p517_p8 = scmp.ne.s32.totalorder %s739_s0, %s516_s11  ;;  %s20_s8 = int_to_ptr.vmem [resolvable:$true] %s19_s8 }
  0x16   :  { %p520_p9 = scmp.lt.u32.totalorder %s516_s11, %s739_s0 }
  0x18   :  { %p522_p10 = pnand %p520_p9, %p517_p8 }
  0x1a   :  { %525 = shalt.err (!%p522_p10)
}
  0x1b   :  { %s526_s16 = scalar_lea.vmem %s20_s8, 128  ;;  %p531_p12 = scmp.lt.s32.totalorder %s20_s8, %s20_s8 }
  0x1c   :  { %p527_p11 = scmp.ne.s32.totalorder %s20_s8, %s526_s16  ;;  %p532_p13 = scmp.lt.s32.totalorder %s526_s16, %s526_s16 }
  0x1e   :  { %p533_p0 = por %p532_p13, %p531_p12 }
  0x20   :  { %p534_p1 = pnand %p533_p0, %p527_p11 }
  0x22   :  { %537 = shalt.err (!%p534_p1)
}
  0x23   :  { %s616_s1 = smov 64   ;;  %s617_s17 = smov 4  }
  0x24   :  { %25 = dma.hbm_to_vmem [thread:$0]  %s739_s0, 128, %s20_s8, [#allocation3], %s616_s1, %s616_s1, %s617_s17  }
  0x25   :  { %s618_s20 = smov [#allocation7]   ;;  %s538_s24 = scalar_lea.hbm %s741_s2, 8192 }
  0x26   :  { %s43_s21 = sshll.u32 %s618_s20, 4  ;;  %p539_p2 = scmp.ne.s32.totalorder %s741_s2, %s538_s24  ;;  %s44_s21 = int_to_ptr.vmem [resolvable:$true] %s43_s21 }
  0x27   :  { %p542_p3 = scmp.lt.u32.totalorder %s538_s24, %s741_s2 }
  0x29   :  { %p544_p4 = pnand %p542_p3, %p539_p2 }
  0x2b   :  { %547 = shalt.err (!%p544_p4)
}
  0x2c   :  { %s548_s29 = scalar_lea.vmem %s44_s21, 8192  ;;  %p553_p6 = scmp.lt.s32.totalorder %s44_s21, %s44_s21 }
  0x2d   :  { %p549_p5 = scmp.ne.s32.totalorder %s44_s21, %s548_s29  ;;  %p554_p7 = scmp.lt.s32.totalorder %s548_s29, %s548_s29 }
  0x2f   :  { %p555_p8 = por %p554_p7, %p553_p6 }
  0x31   :  { %p556_p9 = pnand %p555_p8, %p549_p5 }
  0x33   :  { %559 = shalt.err (!%p556_p9)
}
  0x34   :  { %s619_s0 = smov 256   ;;  %s620_s30 = smov 16  }
  0x35   :  { %49 = dma.hbm_to_vmem [thread:$0]  %s741_s2, 8192, %s44_s21, [#allocation6], %s619_s0, %s619_s0, %s620_s30  }
  0x36   :  { %s621_s8 = smov [#allocation8]   ;;  %s560_s12 = scalar_lea.hbm %s743_s4, 512 }
  0x37   :  { %s57_s9 = sshll.u32 %s621_s8, 4  ;;  %p561_p10 = scmp.ne.s32.totalorder %s743_s4, %s560_s12  ;;  %s58_s9 = int_to_ptr.vmem [resolvable:$true] %s57_s9 }
  0x38   :  { %p564_p11 = scmp.lt.u32.totalorder %s560_s12, %s743_s4 }
  0x3a   :  { %p566_p12 = pnand %p564_p11, %p561_p10 }
  0x3c   :  { %569 = shalt.err (!%p566_p12)
}
  0x3d   :  { %s570_s1 = scalar_lea.vmem %s58_s9, 512  ;;  %p575_p0 = scmp.lt.s32.totalorder %s58_s9, %s58_s9 }
  0x3e   :  { %p571_p13 = scmp.ne.s32.totalorder %s58_s9, %s570_s1  ;;  %p576_p1 = scmp.lt.s32.totalorder %s570_s1, %s570_s1 }
  0x40   :  { %p577_p2 = por %p576_p1, %p575_p0 }
  0x42   :  { %p578_p3 = pnand %p577_p2, %p571_p13 }
  0x44   :  { %581 = shalt.err (!%p578_p3)
}
  0x45   :  { %63 = dma.hbm_to_vmem [thread:$0]  %s743_s4, 512, %s58_s9, [#allocation9], %s619_s0, %s619_s0, %s620_s30  }
  0x46   :  { %604 = dma.done.wait [#allocation3], 128  }
  0x47   :  { %605 = vsyncadd [#allocation3], 4294967168 }
  0x48   :  { %606 = dma.done.wait [#allocation6], 8960  }
  0x49   :  { %607 = vsyncadd [#allocation6], 4294958336 }
  0x4a   :  { %608 = dma.done.wait [#allocation9], 512  }
  0x4b   :  { %609 = vsyncadd [#allocation9], 4294966784  ;;  %v622_v0 = vmov 0   ;;  %v484_v1 = vld [vmem:[#allocation5 + $0x4] ss:$8 sps:$4 sm:$0xff]   ;;  %v224_v7 = vld [vmem:[#allocation7 + $0x8] sm:$0xff] }
  0x4c   :  { %156 = vmatprep.mubr.bf16.mxu0 %v622_v0  ;;  %v486_v2 = vld [vmem:[#allocation5] ss:$8 sps:$4 sm:$0xff]   ;;  %124 = vmatprep.subr.bf16.mxu0 %v484_v1  ;;  %v487_v3 = vld [vmem:[#allocation5 + $0x14] ss:$8 sps:$4 sm:$0xff]   ;;  %v489_v4 = vld [vmem:[#allocation5 + $0x10] ss:$8 sps:$4 sm:$0xff]  }
  0x4d   :  { %125 = vmatpush1.bf16.msra.mxu0 %v486_v2  ;;  %v490_v5 = vld [vmem:[#allocation5 + $0x24] ss:$8 sps:$4 sm:$0xff]   ;;  %v492_v6 = vld [vmem:[#allocation5 + $0x20] ss:$8 sps:$4 sm:$0xff]   ;;  %v223_v10 = vld [vmem:[#allocation7] sm:$0xff]  ;;  %vm120_vm0 = vcmask 392192  }
  0x4e   :  { %126 = vmatprep.subr.bf16.mxu0 %v487_v3  ;;  %v226_v8 = vld [vmem:[#allocation7 + $0x18] sm:$0xff]  ;;  %v225_v11 = vld [vmem:[#allocation7 + $0x10] sm:$0xff]  ;;  %v228_v12 = vld [vmem:[#allocation7 + $0x28] sm:$0xff] }
  0x4f   :  { %v407_v9 = vpack.c.bf16 %v226_v8, %v224_v7  ;;  %v409_v13 = vpack.c.bf16 %v225_v11, %v223_v10  ;;  %v230_v14 = vld [vmem:[#allocation7 + $0x38] sm:$0xff]  ;;  %v227_v15 = vld [vmem:[#allocation7 + $0x20] sm:$0xff]  ;;  %v229_v16 = vld [vmem:[#allocation7 + $0x30] sm:$0xff] }
  0x50   :  { %v411_v17 = vpack.c.bf16 %v230_v14, %v228_v12  ;;  %v232_v18 = vld [vmem:[#allocation7 + $0x48] sm:$0xff]  ;;  %v234_v19 = vld [vmem:[#allocation7 + $0x58] sm:$0xff]  ;;  %v413_v20 = vpack.c.bf16 %v229_v16, %v227_v15  ;;  %v231_v23 = vld [vmem:[#allocation7 + $0x40] sm:$0xff] }
  0x51   :  { %127 = vmatpush1.bf16.msra.mxu0 %v489_v4  ;;  %408 = vmatprep.subr.bf16.mxu1 %v407_v9  ;;  %v493_v21 = vld [vmem:[#allocation2] sm:$0xff]   ;;  %v415_v22 = vpack.c.bf16 %v234_v19, %v232_v18  ;;  %v233_v24 = vld [vmem:[#allocation7 + $0x50] sm:$0xff]  ;;  %v238_v26 = vld [vmem:[#allocation7 + $0x78] sm:$0xff] }
  0x52   :  { %128 = vmatprep.subr.bf16.mxu0 %v490_v5  ;;  %410 = vmatpush1.bf16.msra.mxu1 %v409_v13  ;;  %v236_v25 = vld [vmem:[#allocation7 + $0x68] sm:$0xff]  ;;  %v417_v27 = vpack.c.bf16 %v233_v24, %v231_v23  ;;  %v235_v29 = vld [vmem:[#allocation7 + $0x60] sm:$0xff]  ;;  %v237_v30 = vld [vmem:[#allocation7 + $0x70] sm:$0xff] }
  0x53   :  { %412 = vmatprep.subr.bf16.mxu1 %v411_v17  ;;  %v419_v28 = vpack.c.bf16 %v238_v26, %v236_v25  ;;  %v240_v31 = vld [vmem:[#allocation7 + $0x88] sm:$0xff]  ;;  %v242_v32 = vld [vmem:[#allocation7 + $0x98] sm:$0xff]  ;;  %v421_v33 = vpack.c.bf16 %v237_v30, %v235_v29  ;;  %v239_v35 = vld [vmem:[#allocation7 + $0x80] sm:$0xff] }
  0x54   :  { %v423_v34 = vpack.c.bf16 %v242_v32, %v240_v31  ;;  %v241_v36 = vld [vmem:[#allocation7 + $0x90] sm:$0xff]  ;;  %v244_v37 = vld [vmem:[#allocation7 + $0xa8] sm:$0xff]  ;;  %v246_v38 = vld [vmem:[#allocation7 + $0xb8] sm:$0xff] }
  0x55   :  { %129 = vmatpush1.bf16.msra.mxu0 %v492_v6  ;;  %v425_v39 = vpack.c.bf16 %v241_v36, %v239_v35  ;;  %v427_v40 = vpack.c.bf16 %v246_v38, %v244_v37  ;;  %v243_v41 = vld [vmem:[#allocation7 + $0xa0] sm:$0xff]  ;;  %v245_v42 = vld [vmem:[#allocation7 + $0xb0] sm:$0xff]  ;;  %v248_v43 = vld [vmem:[#allocation7 + $0xc8] sm:$0xff] }
  0x56   :  { %414 = vmatpush1.bf16.msra.mxu1 %v413_v20  ;;  %v250_v44 = vld [vmem:[#allocation7 + $0xd8] sm:$0xff]  ;;  %v429_v45 = vpack.c.bf16 %v245_v42, %v243_v41  ;;  %v247_v47 = vld [vmem:[#allocation7 + $0xc0] sm:$0xff]  ;;  %v249_v48 = vld [vmem:[#allocation7 + $0xd0] sm:$0xff]  ;;  %v169_v41 = vlaneseq }
  0x57   :  { %416 = vmatprep.subr.bf16.mxu1 %v415_v22  ;;  %v431_v46 = vpack.c.bf16 %v250_v44, %v248_v43  ;;  %v252_v49 = vld [vmem:[#allocation7 + $0xe8] sm:$0xff]  ;;  %v254_v50 = vld [vmem:[#allocation7 + $0xf8] sm:$0xff]  ;;  %v433_v51 = vpack.c.bf16 %v249_v48, %v247_v47  ;;  %v251_v53 = vld [vmem:[#allocation7 + $0xe0] sm:$0xff] }
  0x58   :  { %402 = vmatmul.mubr.msk.bf16.vlgmr.msra.gmra.mrb[0].mxu0 %vm120_vm0, %v493_v21  ;;  %v435_v52 = vpack.c.bf16 %v254_v50, %v252_v49  ;;  %v253_v54 = vld [vmem:[#allocation7 + $0xf0] sm:$0xff]  ;;  %v256_v55 = vld [vmem:[#allocation7 + $0x108] sm:$0xff]  ;;  %v258_v56 = vld [vmem:[#allocation7 + $0x118] sm:$0xff]  ;;  %v170_v43 = vshrl.u32 %v169_v41, 7 }
  0x59   :  { %v437_v57 = vpack.c.bf16 %v253_v54, %v251_v53  ;;  %v439_v58 = vpack.c.bf16 %v258_v56, %v256_v55  ;;  %v255_v59 = vld [vmem:[#allocation7 + $0x100] sm:$0xff]  ;;  %v257_v60 = vld [vmem:[#allocation7 + $0x110] sm:$0xff]  ;;  %v260_v61 = vld [vmem:[#allocation7 + $0x128] sm:$0xff] }
  0x5a   :  { %418 = vmatpush1.bf16.msra.mxu1 %v417_v27  ;;  %v262_v62 = vld [vmem:[#allocation7 + $0x138] sm:$0xff]  ;;  %v441_v63 = vpack.c.bf16 %v257_v60, %v255_v59  ;;  %v259_v2 = vld [vmem:[#allocation7 + $0x120] sm:$0xff]  ;;  %v261_v3 = vld [vmem:[#allocation7 + $0x130] sm:$0xff]  ;;  %v203_v44 = vsub.s32 1, %v170_v43  ;;  %v171_v47 = vsub.s32 0, %v170_v43  ;;  %v175_v48 = vsub.s32 2, %v170_v43 }
  0x5b   :  { %420 = vmatprep.subr.bf16.mxu1 %v419_v28  ;;  %v443_v1 = vpack.c.bf16 %v262_v62, %v260_v61  ;;  %v264_v4 = vld [vmem:[#allocation7 + $0x148] sm:$0xff]  ;;  %v266_v5 = vld [vmem:[#allocation7 + $0x158] sm:$0xff]  ;;  %v445_v6 = vpack.c.bf16 %v261_v3, %v259_v2  ;;  %v263_v8 = vld [vmem:[#allocation7 + $0x140] sm:$0xff] }
  0x5c   :  { %v447_v7 = vpack.c.bf16 %v266_v5, %v264_v4  ;;  %v265_v9 = vld [vmem:[#allocation7 + $0x150] sm:$0xff]  ;;  %v268_v10 = vld [vmem:[#allocation7 + $0x168] sm:$0xff]  ;;  %v270_v11 = vld [vmem:[#allocation7 + $0x178] sm:$0xff] }
  0x5d   :  { %v449_v12 = vpack.c.bf16 %v265_v9, %v263_v8  ;;  %v451_v13 = vpack.c.bf16 %v270_v11, %v268_v10  ;;  %v267_v14 = vld [vmem:[#allocation7 + $0x160] sm:$0xff]  ;;  %v269_v15 = vld [vmem:[#allocation7 + $0x170] sm:$0xff]  ;;  %v272_v16 = vld [vmem:[#allocation7 + $0x188] sm:$0xff] }
  0x5e   :  { %422 = vmatpush1.bf16.msra.mxu1 %v421_v33  ;;  %v274_v17 = vld [vmem:[#allocation7 + $0x198] sm:$0xff]  ;;  %v453_v18 = vpack.c.bf16 %v269_v15, %v267_v14  ;;  %v271_v20 = vld [vmem:[#allocation7 + $0x180] sm:$0xff]  ;;  %v273_v21 = vld [vmem:[#allocation7 + $0x190] sm:$0xff] }
  0x5f   :  { %424 = vmatprep.subr.bf16.mxu1 %v423_v34  ;;  %v455_v19 = vpack.c.bf16 %v274_v17, %v272_v16  ;;  %v276_v22 = vld [vmem:[#allocation7 + $0x1a8] sm:$0xff]  ;;  %v278_v23 = vld [vmem:[#allocation7 + $0x1b8] sm:$0xff]  ;;  %v457_v24 = vpack.c.bf16 %v273_v21, %v271_v20  ;;  %v275_v26 = vld [vmem:[#allocation7 + $0x1a0] sm:$0xff] }
  0x60   :  { %v459_v25 = vpack.c.bf16 %v278_v23, %v276_v22  ;;  %v277_v27 = vld [vmem:[#allocation7 + $0x1b0] sm:$0xff]  ;;  %v280_v28 = vld [vmem:[#allocation7 + $0x1c8] sm:$0xff]  ;;  %v282_v29 = vld [vmem:[#allocation7 + $0x1d8] sm:$0xff] }
  0x61   :  { %v461_v30 = vpack.c.bf16 %v277_v27, %v275_v26  ;;  %v463_v31 = vpack.c.bf16 %v282_v29, %v280_v28  ;;  %v279_v32 = vld [vmem:[#allocation7 + $0x1c0] sm:$0xff]  ;;  %v281_v33 = vld [vmem:[#allocation7 + $0x1d0] sm:$0xff]  ;;  %v284_v35 = vld [vmem:[#allocation7 + $0x1e8] sm:$0xff] }
  0x62   :  { %426 = vmatpush1.bf16.msra.mxu1 %v425_v39  ;;  %v465_v34 = vpack.c.bf16 %v281_v33, %v279_v32  ;;  %v286_v36 = vld [vmem:[#allocation7 + $0x1f8] sm:$0xff]  ;;  %v283_v38 = vld [vmem:[#allocation7 + $0x1e0] sm:$0xff]  ;;  %v285_v39 = vld [vmem:[#allocation7 + $0x1f0] sm:$0xff] }
  0x63   :  { %428 = vmatprep.subr.bf16.mxu1 %v427_v40  ;;  %v467_v37 = vpack.c.bf16 %v286_v36, %v284_v35  ;;  %v469_v40 = vpack.c.bf16 %v285_v39, %v283_v38  ;;  %v167_v42 = vld [vmem:[%s742_s3] sm:$0xf]  ;;  %v367_v14 = vld [vmem:[#allocation8 + $0x18] sm:$0xff]  ;;  %s624_s3 = smov [#allocation10]  }
  0x64   :  { %vm199_vm1 = vcmp.ne.f32.partialorder %v167_v42, 0.0  ;;  %v365_v8 = vld [vmem:[#allocation8 + $0x8] sm:$0xff]  ;;  %s381_s19 = sshll.u32 %s624_s3, 4  ;;  %s382_s19 = int_to_ptr.vmem [resolvable:$true] %s381_s19 }
  0x65   :  { %s582_s20 = scalar_lea.vmem %s382_s19, 512  ;;  %p587_p5 = scmp.lt.s32.totalorder %s382_s19, %s382_s19 }
  0x66   :  { %430 = vmatpush1.bf16.msra.mxu1 %v429_v45  ;;  %v200_v45 = vsel %vm199_vm1, 1, %v622_v0  ;;  %v623_v0 = vmov 0.0   ;;  %p583_p4 = scmp.ne.s32.totalorder %s382_s19, %s582_s20  ;;  %p588_p6 = scmp.lt.s32.totalorder %s582_s20, %s582_s20 }
  0x67   :  { %432 = vmatprep.subr.bf16.mxu1 %v431_v46  ;;  %v207_v46 = vsub.s32 3, %v170_v43  ;;  %v204_v49 = vrot.slane %v200_v45, %v203_v44 }
  0x68   :  { %p589_p7 = por %p588_p6, %p587_p5 }
  0x69   :  { %v208_v50 = vrot.slane %v200_v45, %v207_v46  ;;  %v212_v53 = vrot.slane %v204_v49, %v203_v44 }
  0x6a   :  { %434 = vmatpush1.bf16.msra.mxu1 %v433_v51  ;;  %v172_v51 = vrot.slane %v167_v42, %v171_v47  ;;  %p590_p8 = pnand %p589_p7, %p583_p4 }
  0x6b   :  { %436 = vmatprep.subr.bf16.mxu1 %v435_v52  ;;  %v176_v52 = vrot.slane %v167_v42, %v175_v48  ;;  %v216_v55 = vrot.slane %v208_v50, %v203_v44  ;;  %vm217_vm2 = vcmp.eq.s32.totalorder %v212_v53, 1 }
  0x6c   :  { %v182_v54 = vrot.slane %v172_v51, %v171_v47 }
  0x6d   :  { %v186_v56 = vrot.slane %v176_v52, %v171_v47  ;;  %vm714_vm4 = vcmp.eq.s32.totalorder %v216_v55, 1 }
  0x6e   :  { %438 = vmatpush1.bf16.msra.mxu1 %v437_v57 }
  0x6f   :  { %440 = vmatprep.subr.bf16.mxu1 %v439_v58 }
  0x72   :  { %442 = vmatpush1.bf16.msra.mxu1 %v441_v63 }
  0x73   :  { %444 = vmatprep.subr.bf16.mxu1 %v443_v1 }
  0x76   :  { %446 = vmatpush1.bf16.msra.mxu1 %v445_v6 }
  0x77   :  { %448 = vmatprep.subr.bf16.mxu1 %v447_v7  ;;  %v364_v7 = vld [vmem:[#allocation8] sm:$0xff] }
  0x7a   :  { %450 = vmatpush1.bf16.msra.mxu1 %v449_v12 }
  0x7b   :  { %452 = vmatprep.subr.bf16.mxu1 %v451_v13  ;;  %v366_v13 = vld [vmem:[#allocation8 + $0x10] sm:$0xff] }
  0x7e   :  { %454 = vmatpush1.bf16.msra.mxu1 %v453_v18 }
  0x7f   :  { %456 = vmatprep.subr.bf16.mxu1 %v455_v19 }
  0x82   :  { %458 = vmatpush1.bf16.msra.mxu1 %v457_v24 }
  0x83   :  { %460 = vmatprep.subr.bf16.mxu1 %v459_v25 }
  0x86   :  { %462 = vmatpush1.bf16.msra.mxu1 %v461_v30 }
  0x87   :  { %464 = vmatprep.subr.bf16.mxu1 %v463_v31 }
  0x8a   :  { %466 = vmatpush1.bf16.msra.mxu1 %v465_v34 }
  0x8b   :  { %468 = vmatprep.subr.bf16.mxu1 %v467_v37 }
  0x8e   :  { %470 = vmatpush1.bf16.msra.mxu1 %v469_v40 }
 0x12b   :  { %v158_v57 = vpop.f32.mrb[0].mxu0 }
 0x12c   :  { %vm187_vm3 = vcmp.eq.f32.partialorder %v158_v57, %v182_v54  ;;  %v160_v58 = vpop.f32.mrb[1].mxu0 }
 0x12d   :  { %v403_v60 = vsel %vm187_vm3, 1.0, %v623_v0  ;;  %vm188_vm5 = vcmp.eq.f32.partialorder %v160_v58, %v186_v56  ;;  %v162_v61 = vpop.f32.mrb[2].mxu0 }
 0x12e   :  { %vm189_vm6 = vcmp.eq.f32.partialorder %v162_v61, %v182_v54  ;;  %v164_v62 = vpop.f32.mrb[3].mxu0  ;;  %v404_v63 = vsel %vm188_vm5, 1.0, %v623_v0  ;;  %v219_v1 = vsel %vm217_vm2, %v158_v57, %v403_v60 }
 0x12f   :  { %v405_v2 = vsel %vm189_vm6, 1.0, %v623_v0  ;;  %vm190_vm7 = vcmp.eq.f32.partialorder %v164_v62, %v186_v56  ;;  %v220_v3 = vsel %vm714_vm4, %v160_v58, %v404_v63 }
 0x130   :  { %v406_v4 = vsel %vm190_vm7, 1.0, %v623_v0  ;;  %351 = vmatprep.mubr.f32.mxu1 %v220_v3  ;;  %v221_v5 = vsel %vm217_vm2, %v162_v61, %v405_v2 }
 0x131   :  { %352 = vmatmul.mubr.f32.vlgmr.msra.gmra.mrb[0].mxu1 %v219_v1  ;;  %v222_v6 = vsel %vm714_vm4, %v164_v62, %v406_v4 }
 0x132   :  { %357 = vmatprep.mubr.f32.mxu1 %v222_v6 }
 0x135   :  { %358 = vmatmul.mubr.f32.gmra.mrb[2].mxu1 %v221_v5 }
 0x204   :  { %v353_v9 = vpop.f32.mrb[0].mxu1 }
 0x205   :  { %v368_v10 = vadd.f32 %v364_v7, %v353_v9  ;;  %v355_v11 = vpop.f32.mrb[1].mxu1 }
 0x206   :  { %v369_v12 = vadd.f32 %v365_v8, %v355_v11 }
 0x207   :  { %372 = vst [vmem:[#allocation10] sm:$0xff] %v368_v10 }
 0x208   :  { %373 = vst [vmem:[#allocation10 + $0x8] sm:$0xff] %v369_v12  ;;  %v359_v15 = vpop.f32.mrb[2].mxu1 }
 0x209   :  { %v370_v16 = vadd.f32 %v366_v13, %v359_v15  ;;  %v361_v17 = vpop.f32.mrb[3].mxu1 }
 0x20a   :  { %v371_v18 = vadd.f32 %v367_v14, %v361_v17 }
 0x20b   :  { %374 = vst [vmem:[#allocation10 + $0x10] sm:$0xff] %v370_v16 }
 0x20c   :  { %375 = vst [vmem:[#allocation10 + $0x18] sm:$0xff] %v371_v18 }
 0x20d   :  { %593 = shalt.err (!%p590_p8)
}
 0x20e   :  { %s594_s23 = scalar_lea.hbm %s744_s5, 512 }
 0x20f   :  { %p595_p9 = scmp.ne.s32.totalorder %s744_s5, %s594_s23  ;;  %p598_p10 = scmp.lt.u32.totalorder %s594_s23, %s744_s5 }
 0x211   :  { %p600_p11 = pnand %p598_p10, %p595_p9 }
 0x213   :  { %603 = shalt.err (!%p600_p11)
}
 0x214   :  { %387 = dma.vmem_to_hbm [thread:$0]  %s382_s19, 512, %s744_s5, [#allocation4], %s619_s0, %s619_s0, %s620_s30  }
 0x215   :  { %610 = dma.done.wait [#allocation4], 512  }
 0x216   :  { %611 = vsyncadd [#allocation4], 4294966784 }
 0x217   :  { %391 = vsyncpa [#allocation3], 1 }
 0x218   :  { %392 = vsyncpa [#allocation6], 1 }
 0x219   :  { %393 = vsyncpa [#allocation9], 1 }
 0x21a   :  { %394 = vsyncpa [#allocation4], 1 }

</bundles_post_ra>
